<compile_context>
chip_gen: v7x
topology: tpu7x:2x2x1
jax: 0.10.0
libtpu: 0.0.40
codegen_flags: <defaults>
</compile_context>

<pallas_src>
import jax
import jax.numpy as jnp
from jax import lax
from jax.experimental import pallas as pl
from jax.experimental.pallas import tpu as pltpu


def _mlp_kernel(x_ref, w1_ref, b1_ref, w2_ref, b2_ref, o_ref):
    # x_ref: [TB, F] tile in native torch layout; w1_ref: [H, F] bf16 (VMEM-resident).
    x_bf = x_ref[...].astype(jnp.bfloat16)
    # hidden = W1 @ x^T -> [H, TB]: batch on the lane axis, bf16 MXU, f32 accumulate.
    h = lax.dot_general(
        w1_ref[...], x_bf,
        dimension_numbers=(((1,), (1,)), ((), ())),   # contract F with F (NT matmul)
        preferred_element_type=jnp.float32)
    h = jnp.maximum(h + b1_ref[...], 0.0)              # b1 is [H,1], broadcasts over lanes
    # TODO(synk): nn.Dropout is identity in eval mode; training-mode dropout
    # (pltpu.prng_random_bits mask + 1/(1-p) scale) intentionally not applied here.
    # Output layer (H -> 1): VPU multiply + XLU sublane reduce (avoids an M=1 MXU matmul).
    o_ref[...] = jnp.sum(h * w2_ref[...], axis=0, keepdims=True) + b2_ref[...]


def house_price_mlp(x, w1, b1, w2, b2, *, tb=16384):
    """Eval-mode forward pass of HousePriceMLP.

    x : [B, F]  float32 (native torch layout, read directly — no wrapper pad/transpose)
    w1: [H, F]  hidden.weight
    b1: [H]     hidden.bias
    w2: [1, H]  output.weight
    b2: [1]     output.bias
    Returns [B, 1] float32 (same as the torch module).
    """
    B, F = x.shape
    H = w1.shape[0]

    # Tile the batch (sublane axis of the input tile, lane axis of the output slab).
    if B <= tb:
        tb_eff = B                                   # single block == full array dims
    else:
        tb_eff = max(128, (tb // 128) * 128)         # lane-aligned tile; trailing tile partial
    grid = (pl.cdiv(B, tb_eff),)

    # Tiny weights/biases: VMEM-resident across all grid steps.
    w1c = w1.astype(jnp.bfloat16)                    # [H, F] bf16 for the MXU
    b1c = b1.reshape(H, 1).astype(jnp.float32)
    w2c = w2.reshape(H, 1).astype(jnp.float32)
    b2c = b2.reshape(1, 1).astype(jnp.float32)

    flops = 2 * B * F * H + 4 * B * H
    bytes_accessed = (x.size * x.dtype.itemsize + w1c.size * 2
                      + (b1c.size + w2c.size + b2c.size + B) * 4)

    out = pl.pallas_call(
        _mlp_kernel,
        out_shape=jax.ShapeDtypeStruct((1, B), jnp.float32),
        grid_spec=pltpu.PrefetchScalarGridSpec(
            num_scalar_prefetch=0,
            grid=grid,
            in_specs=[
                pl.BlockSpec((tb_eff, F), lambda i: (i, 0)),   # streamed, double-buffered x tile
                pl.BlockSpec((H, F), lambda i: (0, 0)),        # resident weights/biases
                pl.BlockSpec((H, 1), lambda i: (0, 0)),
                pl.BlockSpec((H, 1), lambda i: (0, 0)),
                pl.BlockSpec((1, 1), lambda i: (0, 0)),
            ],
            out_specs=pl.BlockSpec((1, tb_eff), lambda i: (0, i)),  # lane-dense output slab
        ),
        compiler_params=pltpu.CompilerParams(
            dimension_semantics=("parallel",),       # independent batch tiles (v7x: 2 TCs)
            vmem_limit_bytes=48 * 1024 * 1024,       # [TB,16] tile lane-pads 16->128 in VMEM
        ),
        cost_estimate=pl.CostEstimate(
            flops=flops, transcendentals=0, bytes_accessed=bytes_accessed),
    )(x, w1c, b1c, w2c, b2c)

    return out.reshape(B, 1)


def init_params(key, input_size, hidden_size=32):
    """Torch-native layouts, xavier_normal_ weights, zero biases (as in _init_weights)."""
    k1, k2 = jax.random.split(key)
    std1 = (2.0 / (input_size + hidden_size)) ** 0.5
    std2 = (2.0 / (hidden_size + 1)) ** 0.5
    w1 = jax.random.normal(k1, (hidden_size, input_size), jnp.float32) * std1  # [H, F]
    b1 = jnp.zeros((hidden_size,), jnp.float32)                                # [H]
    w2 = jax.random.normal(k2, (1, hidden_size), jnp.float32) * std2           # [1, H]
    b2 = jnp.zeros((1,), jnp.float32)                                          # [1]
    return w1, b1, w2, b2


if __name__ == "__main__":
    key = jax.random.PRNGKey(0)
    kx, kp = jax.random.split(key)

    batch, input_size, hidden_size = 8, 16, 32
    x = jax.random.normal(kx, (batch, input_size), jnp.float32)
    w1, b1, w2, b2 = init_params(kp, input_size, hidden_size)

    out = house_price_mlp(x, w1, b1, w2, b2)
    jax.block_until_ready(out)
    assert out.shape == (batch, 1)

    # Reference with matched bf16 rounding on the first matmul (tight check).
    xb = x.astype(jnp.bfloat16)
    w1b = w1.astype(jnp.bfloat16)
    h_ref = jnp.maximum(
        jnp.dot(xb, w1b.T, preferred_element_type=jnp.float32) + b1, 0.0)
    ref_bf16 = h_ref @ w2.T + b2
    assert jnp.allclose(out, ref_bf16, atol=1e-3, rtol=1e-3)

    # Pure-f32 reference (semantic sanity; loose tolerance due to bf16 MXU inputs).
    ref_f32 = jnp.maximum(x @ w1.T + b1, 0.0) @ w2.T + b2
    assert jnp.allclose(out, ref_f32, atol=5e-2, rtol=5e-2)

    print("KERNEL_OK")
</pallas_src>

<mosaic_0001>
module attributes {stable_mosaic.version = 11 : i64} {
  func.func @_mlp_kernel(%arg0: i32, %arg1: memref<8x16xf32, #tpu.memory_space<vmem>>, %arg2: memref<32x16xbf16, #tpu.memory_space<vmem>>, %arg3: memref<32x1xf32, #tpu.memory_space<vmem>>, %arg4: memref<32x1xf32, #tpu.memory_space<vmem>>, %arg5: memref<1x1xf32, #tpu.memory_space<vmem>>, %arg6: memref<1x8xf32, #tpu.memory_space<vmem>>) attributes {dimension_semantics = [#tpu.dimension_semantics<parallel>], iteration_bounds = array<i64: 1>, scalar_prefetch = 0 : i64, scratch_operands = 0 : i64, tpu.core_type = #tpu.core_type<tc>, window_params = [{transform_indices = @transform_0, window_bounds = array<i64: 8, 16>}, {pipeline_mode = #tpu.pipeline_mode<synchronous>, transform_indices = @transform_1, window_bounds = array<i64: 32, 16>}, {pipeline_mode = #tpu.pipeline_mode<synchronous>, transform_indices = @transform_2, window_bounds = array<i64: 32, 1>}, {pipeline_mode = #tpu.pipeline_mode<synchronous>, transform_indices = @transform_3, window_bounds = array<i64: 32, 1>}, {pipeline_mode = #tpu.pipeline_mode<synchronous>, transform_indices = @transform_4, window_bounds = array<i64: 1, 1>}, {transform_indices = @transform_5, window_bounds = array<i64: 1, 8>}]} {
    %c0 = arith.constant 0 : index
    %c0_0 = arith.constant 0 : index
    %0 = vector.load %arg1[%c0, %c0_0] : memref<8x16xf32, #tpu.memory_space<vmem>>, vector<8x16xf32>
    %1 = arith.truncf %0 : vector<8x16xf32> to vector<8x16xbf16>
    %c0_1 = arith.constant 0 : index
    %c0_2 = arith.constant 0 : index
    %2 = vector.load %arg2[%c0_1, %c0_2] : memref<32x16xbf16, #tpu.memory_space<vmem>>, vector<32x16xbf16>
    %cst = arith.constant dense<0.000000e+00> : vector<32x8xf32>
    %3 = tpu.matmul %2, %1, %cst {dimension_numbers = #tpu.dot_dimension_numbers<[1], [1], [0], [0], [0, 0, 1, 0], [], []>} : vector<32x16xbf16>, vector<8x16xbf16>, vector<32x8xf32> -> vector<32x8xf32>
    %c0_3 = arith.constant 0 : index
    %c0_4 = arith.constant 0 : index
    %4 = vector.load %arg3[%c0_3, %c0_4] : memref<32x1xf32, #tpu.memory_space<vmem>>, vector<32x1xf32>
    %5 = vector.broadcast %4 : vector<32x1xf32> to vector<32x8xf32>
    %6 = arith.addf %3, %5 : vector<32x8xf32>
    %cst_5 = arith.constant 0.000000e+00 : f32
    %7 = vector.broadcast %cst_5 : f32 to vector<32x8xf32>
    %8 = arith.maximumf %6, %7 : vector<32x8xf32>
    %c0_6 = arith.constant 0 : index
    %c0_7 = arith.constant 0 : index
    %9 = vector.load %arg4[%c0_6, %c0_7] : memref<32x1xf32, #tpu.memory_space<vmem>>, vector<32x1xf32>
    %10 = vector.broadcast %9 : vector<32x1xf32> to vector<32x8xf32>
    %11 = arith.mulf %8, %10 : vector<32x8xf32>
    %cst_8 = arith.constant dense<0.000000e+00> : vector<8xf32>
    %12 = vector.multi_reduction <add>, %11, %cst_8 [0] : vector<32x8xf32> to vector<8xf32>
    %13 = vector.shape_cast %12 : vector<8xf32> to vector<1x8xf32>
    %c0_9 = arith.constant 0 : index
    %c0_10 = arith.constant 0 : index
    %14 = vector.load %arg5[%c0_9, %c0_10] : memref<1x1xf32, #tpu.memory_space<vmem>>, vector<1x1xf32>
    %15 = vector.broadcast %14 : vector<1x1xf32> to vector<1x8xf32>
    %16 = arith.addf %13, %15 : vector<1x8xf32>
    %c0_11 = arith.constant 0 : index
    %c0_12 = arith.constant 0 : index
    %17 = vector.load %arg6[%c0_11, %c0_12] : memref<1x8xf32, #tpu.memory_space<vmem>>, vector<1x8xf32>
    tpu.vector_store %arg6[%c0_11, %c0_12], %16 {strides = array<i32>} : memref<1x8xf32, #tpu.memory_space<vmem>>, vector<1x8xf32>,
    return
  }
  func.func @transform_0(%arg0: i32) -> (i32, i32) {
    %c0_i32 = arith.constant 0 : i32
    %c0_i32_0 = arith.constant 0 : i32
    return %arg0, %c0_i32 : i32, i32
  }
  func.func @transform_1(%arg0: i32) -> (i32, i32) {
    %c0_i32 = arith.constant 0 : i32
    %c0_i32_0 = arith.constant 0 : i32
    %c0_i32_1 = arith.constant 0 : i32
    return %c0_i32, %c0_i32_0 : i32, i32
  }
  func.func @transform_2(%arg0: i32) -> (i32, i32) {
    %c0_i32 = arith.constant 0 : i32
    %c0_i32_0 = arith.constant 0 : i32
    %c0_i32_1 = arith.constant 0 : i32
    return %c0_i32, %c0_i32_0 : i32, i32
  }
  func.func @transform_3(%arg0: i32) -> (i32, i32) {
    %c0_i32 = arith.constant 0 : i32
    %c0_i32_0 = arith.constant 0 : i32
    %c0_i32_1 = arith.constant 0 : i32
    return %c0_i32, %c0_i32_0 : i32, i32
  }
  func.func @transform_4(%arg0: i32) -> (i32, i32) {
    %c0_i32 = arith.constant 0 : i32
    %c0_i32_0 = arith.constant 0 : i32
    %c0_i32_1 = arith.constant 0 : i32
    return %c0_i32, %c0_i32_0 : i32, i32
  }
  func.func @transform_5(%arg0: i32) -> (i32, i32) {
    %c0_i32 = arith.constant 0 : i32
    %c0_i32_0 = arith.constant 0 : i32
    return %c0_i32, %arg0 : i32, i32
  }
}

</mosaic_0001>

<bundles_post_ra>
// kernel: tpu_custom_call.1
= control target key start
LH: loop header
LB: loop body
LE: loop exit
PB: predicated region body
PF: predicated region fallthrough
CT: control target
= control target key end

     0   :  { %s324_s0 = inlined_call_operand.vmem [shape: f32[8,16], index: 0, kind: input, shape index: {}]   ;;  %s325_s1 = inlined_call_operand.vmem [shape: bf16[32,16], index: 1, kind: input, shape index: {}]   ;;  %s326_s2 = inlined_call_operand.vmem [shape: f32[32,1], index: 2, kind: input, shape index: {}]   ;;  %s327_s3 = inlined_call_operand.vmem [shape: f32[32,1], index: 3, kind: input, shape index: {}]   ;;  %s328_s4 = inlined_call_operand.<no memory space> [shape: f32[1,1], index: 4, kind: input, shape index: {}]   ;;  %s329_s5 = inlined_call_operand.hbm [shape: f32[1,8], index: 5, kind: output, shape index: {}]  }
   0x1   :  { %v10_v0 = vstv %s328_s4 }
   0x2   :  { %11 = vst [vmem:[#allocation2] sm:$0x1] %v10_v0 }
   0x3   :  { %v24_v1 = vld [vmem:[%s324_s0] sm:$0xff]  ;;  %vm64_vm0 = vcmask 130048   ;;  %v240_v4 = vmov 0   ;;  %v32_v7 = vld [vmem:[%s326_s2 + $0x10] sm:$0xff]  ;;  %v31_v8 = vld [vmem:[%s326_s2 + $0x8] sm:$0xff] }
   0x4   :  { %v25_v2 = vpack.c.bf16 %v24_v1, %v24_v1  ;;  %v214_v3 = vld [vmem:[%s325_s1] sm:$0xff]   ;;  %212 = vset.pattern.permute.xlu0 %v240_v4  ;;  %213 = vset.pattern.permute.xlu1 %v240_v4 }
   0x5   :  { %v30_v5 = vld [vmem:[%s326_s2] sm:$0xff]  ;;  %205 = vmatprep.mubr.msk.bf16.mxu0 %vm64_vm0, %v214_v3  ;;  %46 = vperm.xlu1 %213, %v32_v7  }
   0x6   :  { %209 = vmatprep.subr.msk.bf16.mxu0 %vm64_vm0, %v25_v2  ;;  %v72_v6 = vsel %vm64_vm0, %v25_v2, 0  ;;  %36 = vperm.xlu0 %212, %v30_v5  }
   0x7   :  { %204 = vmatpush3.bf16.xpose.msra.mxu0 %v72_v6 }
   0x8   :  { %12 = vsyncpa [#allocation4], 0  ;;  %v33_v9 = vld [vmem:[%s326_s2 + $0x18] sm:$0xff]  ;;  %v215_v10 = vld [vmem:[%s325_s1 + $0x8] sm:$0xff]   ;;  %vm155_vm1 = vcmask 64512   ;;  %v175_v46 = vlaneseq  ;;  %vm180_vm2 = vcmask 57344  }
   0x9   :  { %v127_v11 = vld [vmem:[%s327_s3] sm:$0xff]  ;;  %51 = vperm.xlu1 %213, %v33_v9   ;;  %v128_v12 = vld [vmem:[%s327_s3 + $0x8] sm:$0xff]  ;;  %v129_v13 = vld [vmem:[%s327_s3 + $0x10] sm:$0xff] }
   0xa   :  { %41 = vperm.xlu0 %212, %v31_v8   ;;  %v130_v14 = vld [vmem:[%s327_s3 + $0x18] sm:$0xff]  ;;  %v169_v15 = vld [vmem:[#allocation2] sm:$0x1]  ;;  %v176_v49 = vshrl.u32 %v175_v46, 7  ;;  %s241_s3 = smov [#allocation3]  }
   0xb   :  { %s188_s13 = sshll.u32 %s241_s3, 4  ;;  %s189_s13 = int_to_ptr.vmem [resolvable:$true] %s188_s13 }
   0xc   :  { %v177_v52 = vsub.s32 0, %v176_v49  ;;  %s216_s14 = scalar_lea.vmem %s189_s13, 16  ;;  %s220_s15 = scalar_lea.vmem %s189_s13, 32 }
   0xd   :  { %138 = vperm.xlu1 %213, %v128_v12   ;;  %p217_p0 = scmp.ne.s32.totalorder %s189_s13, %s216_s14  ;;  %p221_p1 = scmp.lt.s32.totalorder %s189_s13, %s189_s13 }
   0xe   :  { %206 = vmatmul.mubr.msk.bf16.vlgmr.msra.gmra.mrb[0].mxu0 %vm64_vm0, %v215_v10  ;;  %133 = vperm.xlu0 %212, %v127_v11   ;;  %p222_p2 = scmp.lt.s32.totalorder %s220_s15, %s216_s14 }
  0x10   :  { %p223_p3 = por %p222_p2, %p221_p1 }
  0x11   :  { %148 = vperm.xlu1 %213, %v130_v14  }
  0x12   :  { %143 = vperm.xlu0 %212, %v129_v13   ;;  %p224_p4 = pnand %p223_p3, %p217_p0 }
  0x16   :  { %172 = vperm.xlu0 %212, %v169_v15  }
  0x84   :  { %v47_v17 = vpop.permute.xlu1 %46 }
  0x85   :  { %v37_v16 = vpop.permute.xlu0 %36 }
  0x88   :  { %v52_v19 = vpop.permute.xlu1 %51 }
  0x89   :  { %v42_v18 = vpop.permute.xlu0 %41 }
  0x8c   :  { %v139_v26 = vpop.permute.xlu1 %138 }
  0x8d   :  { %v134_v21 = vpop.permute.xlu0 %133 }
  0x90   :  { %v149_v38 = vpop.permute.xlu1 %148 }
  0x91   :  { %v144_v35 = vpop.permute.xlu0 %143 }
  0x95   :  { %v173_v54 = vpop.permute.xlu0 %172 }
  0x96   :  { %v178_v56 = vrot.slane %v173_v54, %v177_v52 }
  0xe1   :  { %v207_v20 = vpop.f32.mrb[0].mxu0 }
  0xe2   :  { %v117_v22 = vadd.f32 %v207_v20, %v47_v17  ;;  %v108_v23 = vpop.f32.mrb[1].mxu0 }
  0xe3   :  { %v109_v24 = vadd.f32 %v108_v23, %v37_v16  ;;  %v208_v25 = vpop.f32.mrb[2].mxu0 }
  0xe4   :  { %v120_v27 = vadd.f32 %v208_v25, %v52_v19  ;;  %v111_v28 = vpop.f32.mrb[3].mxu0  ;;  %v125_v29 = vmax.f32 %v117_v22, 0.0 }
  0xe5   :  { %v123_v30 = vmax.f32 %v109_v24, 0.0  ;;  %v112_v31 = vadd.f32 %v111_v28, %v42_v18 }
  0xe6   :  { %v126_v33 = vmax.f32 %v120_v27, 0.0  ;;  %v153_v36 = vmul.f32 %v144_v35, %v125_v29 }
  0xe7   :  { %v151_v32 = vmul.f32 %v134_v21, %v123_v30  ;;  %v124_v34 = vmax.f32 %v112_v31, 0.0 }
  0xe8   :  { %v154_v40 = vmul.f32 %v149_v38, %v126_v33  ;;  %v159_v43 = vsel %vm155_vm1, %v153_v36, 0.0 }
  0xe9   :  { %v152_v37 = vmul.f32 %v139_v26, %v124_v34  ;;  %v156_v39 = vsel %vm155_vm1, %v151_v32, 0.0 }
  0xea   :  { %v161_v45 = vsel %vm155_vm1, %v154_v40, 0.0 }
  0xeb   :  { %v157_v41 = vsel %vm155_vm1, %v152_v37, 0.0 }
  0xec   :  { %v158_v42 = vadd.f32 %v157_v41, %v156_v39 }
  0xee   :  { %v160_v44 = vadd.f32 %v159_v43, %v158_v42 }
  0xf0   :  { %v162_v47 = vadd.f32 %v161_v45, %v160_v44 }
  0xf2   :  { %v163_v48 = vrot.slane %v162_v47, 4 }
  0xf4   :  { %v164_v50 = vadd.f32 %v163_v48, %v162_v47 }
  0xf6   :  { %v165_v51 = vrot.slane %v164_v50, 2 }
  0xf8   :  { %v166_v53 = vadd.f32 %v165_v51, %v164_v50 }
  0xfa   :  { %v167_v55 = vrot.slane %v166_v53, 1 }
  0xfc   :  { %v168_v57 = vadd.f32 %v167_v55, %v166_v53 }
  0xfe   :  { %v179_v58 = vadd.f32 %v178_v56, %v168_v57 }
 0x100   :  { %181 = vst.msk [vmem:[#allocation3] sm:$0x1] %vm180_vm2, %v179_v58 }
 0x101   :  { %227 = shalt.err (!%p224_p4)
}
 0x102   :  { %s228_s18 = scalar_lea.hbm %s329_s5, 16 }
 0x103   :  { %p229_p5 = scmp.ne.s32.totalorder %s329_s5, %s228_s18  ;;  %p232_p6 = scmp.lt.u32.totalorder %s228_s18, %s329_s5 }
 0x105   :  { %p234_p7 = pnand %p232_p6, %p229_p5 }
 0x107   :  { %237 = shalt.err (!%p234_p7)
}
 0x108   :  { %191 = dma.vmem_to_hbm [thread:$0]  %s189_s13, 16, %s329_s5, [#allocation4]  }
 0x109   :  { %238 = dma.done.wait [#allocation4], 16  }
 0x10a   :  { %239 = vsyncadd [#allocation4], 4294967280 }
 0x10b   :  { %195 = vsyncpa [#allocation4], 1 }

</bundles_post_ra>
